<compile_context>
chip_gen: v7x
topology: tpu7x:2x2x1
jax: 0.10.0
libtpu: 0.0.40
codegen_flags: <defaults>
</compile_context>

<pallas_src>
import jax
import jax.numpy as jnp
from jax.experimental import pallas as pl
from jax.experimental.pallas import tpu as pltpu

_TARGET_TILE_BYTES = 4 * 1024 * 1024   # ~4 MiB per block (fits all gens' VMEM)
_MAX_LANE = 16384                      # cap on reused trailing-dim lane width
_SMALL_N = 4096                        # below this, plain XLA beats a pallas_call


def _linear_embedding_kernel(params_ref, x_ref, o_ref):
    # params_ref: (2,) float32 in SMEM = [size, scale]
    size = params_ref[0]
    scale = params_ref[1]
    val = x_ref[...].astype(jnp.float32) / size * scale
    o_ref[...] = val.astype(o_ref.dtype)


def _pick_row_tile(rows: int, lane: int, itemsize: int) -> int:
    """Row tile: ~_TARGET_TILE_BYTES per block, multiple of 8, and at least
    two grid steps when possible (so v7x shards across both TensorCores)."""
    if rows <= 8:
        return rows  # full extent (allowed even if not a multiple of 8)
    tb_target = max(8, ((_TARGET_TILE_BYTES // (lane * itemsize)) // 8) * 8)
    tb_half = max(8, ((pl.cdiv(rows, 2) + 7) // 8) * 8)   # -> >= 2 grid steps
    return min(tb_target, tb_half)


def _scale_2d(x2d, params):
    """Tiled elementwise (x / size * scale) on a (rows, lane) array."""
    rows, lane = x2d.shape
    itemsize = x2d.dtype.itemsize
    tb = _pick_row_tile(rows, lane, itemsize)
    nblocks = pl.cdiv(rows, tb)

    return pl.pallas_call(
        _linear_embedding_kernel,
        out_shape=jax.ShapeDtypeStruct((rows, lane), x2d.dtype),
        grid_spec=pltpu.PrefetchScalarGridSpec(
            num_scalar_prefetch=0,
            grid=(nblocks,),
            in_specs=[
                pl.BlockSpec(memory_space=pltpu.MemorySpace.SMEM),  # [size, scale]
                pl.BlockSpec((tb, lane), lambda i: (i, 0)),         # x tile
            ],
            out_specs=pl.BlockSpec((tb, lane), lambda i: (i, 0)),
        ),
        compiler_params=pltpu.CompilerParams(
            dimension_semantics=("parallel",),
            vmem_limit_bytes=48 * 1024 * 1024,
        ),
        cost_estimate=pl.CostEstimate(
            flops=2 * rows * lane,
            transcendentals=0,
            bytes_accessed=2 * rows * lane * itemsize,
        ),
    )(params, x2d)


def linear_embedding(x, size: int, scale: float = 1.0):
    """Pallas implementation of LinearEmbedding.forward.

    Returns an array of shape (*x.shape, 1), matching `x.unsqueeze(-1)`.
    """
    orig_shape = x.shape
    # Match torch promotion: integer inputs are promoted by the division.
    if not jnp.issubdtype(x.dtype, jnp.floating):
        x = x.astype(jnp.float32)
    n = x.size

    # Tiny inputs: kernel launch + layout glue dwarf the work; let XLA fuse it.
    if n < _SMALL_N:
        return (x / size * scale).reshape(*orig_shape, 1)

    params = jnp.array([size, scale], dtype=jnp.float32)

    # Pick a lane-dense 2-D layout, avoiding any padding whenever possible.
    lane = None
    if orig_shape and orig_shape[-1] % 128 == 0 and 0 < orig_shape[-1] <= _MAX_LANE:
        lane = orig_shape[-1]
    else:
        for cand in (1024, 512, 256, 128):
            if n % cand == 0:
                lane = cand
                break

    if lane is not None:
        out2d = _scale_2d(x.reshape(n // lane, lane), params)
        return out2d.reshape(*orig_shape, 1)

    # Unaligned element count: pad the flat array only up to one lane-dense
    # row (ragged row blocks are handled by the grid's masked boundary block).
    lane = 1024 if n >= 1024 else 128
    rows = pl.cdiv(n, lane)
    padded_n = rows * lane
    flat = jnp.pad(x.reshape(-1), (0, padded_n - n))
    out_flat = _scale_2d(flat.reshape(rows, lane), params).reshape(-1)[:n]
    return out_flat.reshape(*orig_shape, 1)


if __name__ == "__main__":
    size = 32
    scale = 1.0

    key = jax.random.PRNGKey(0)
    k1, k2, k3 = jax.random.split(key, 3)

    # 1) Small input consistent with the module (batch=2, seq=8): XLA path.
    x = jax.random.uniform(k1, (2, 8), dtype=jnp.float32) * size
    out = jax.block_until_ready(linear_embedding(x, size=size, scale=scale))
    ref = (x / size * scale)[..., None]
    assert out.shape == (2, 8, 1), out.shape
    assert jnp.allclose(out, ref, atol=1e-6), "mismatch vs reference (small)"

    # 2) Lane-aligned input: kernel path with no padding (trailing dim 512).
    x3 = jax.random.uniform(k3, (16, 512), dtype=jnp.float32) * size
    out3 = jax.block_until_ready(linear_embedding(x3, size=size, scale=scale))
    ref3 = (x3 / size * scale)[..., None]
    assert out3.shape == (16, 512, 1), out3.shape
    assert jnp.allclose(out3, ref3, atol=1e-6), "mismatch vs reference (aligned)"

    # 3) Unaligned input: kernel path with minimal flat padding + ragged grid.
    x2 = jax.random.uniform(k2, (520, 700), dtype=jnp.float32) * size
    out2 = jax.block_until_ready(linear_embedding(x2, size=size, scale=scale))
    ref2 = (x2 / size * scale)[..., None]
    assert out2.shape == (520, 700, 1), out2.shape
    assert jnp.allclose(out2, ref2, atol=1e-6), "mismatch vs reference (unaligned)"

    # 4) Integer input: promoted to float like torch's `x / size`.
    xi = jnp.arange(2 * 8, dtype=jnp.int32).reshape(2, 8)
    outi = jax.block_until_ready(linear_embedding(xi, size=size, scale=scale))
    refi = (xi.astype(jnp.float32) / size * scale)[..., None]
    assert outi.shape == (2, 8, 1) and outi.dtype == jnp.float32
    assert jnp.allclose(outi, refi, atol=1e-6), "mismatch vs reference (int)"

    print("KERNEL_OK")
</pallas_src>

<mosaic_0001>
module attributes {stable_mosaic.version = 11 : i64} {
  func.func @_linear_embedding_kernel(%arg0: i32, %arg1: memref<2xf32, #tpu.memory_space<smem>>, %arg2: memref<8x512xf32, #tpu.memory_space<vmem>>, %arg3: memref<8x512xf32, #tpu.memory_space<vmem>>) attributes {dimension_semantics = [#tpu.dimension_semantics<parallel>], iteration_bounds = array<i64: 2>, scalar_prefetch = 0 : i64, scratch_operands = 0 : i64, tpu.core_type = #tpu.core_type<tc>, window_params = [{transform_indices = @transform_0, window_bounds = array<i64: 2>}, {transform_indices = @transform_1, window_bounds = array<i64: 8, 512>}, {transform_indices = @transform_2, window_bounds = array<i64: 8, 512>}]} {
    %c0 = arith.constant 0 : index
    %0 = memref.load %arg1[%c0] : memref<2xf32, #tpu.memory_space<smem>>
    %c1 = arith.constant 1 : index
    %1 = memref.load %arg1[%c1] : memref<2xf32, #tpu.memory_space<smem>>
    %c0_0 = arith.constant 0 : index
    %c0_1 = arith.constant 0 : index
    %2 = vector.load %arg2[%c0_0, %c0_1] : memref<8x512xf32, #tpu.memory_space<vmem>>, vector<8x512xf32>
    %3 = vector.broadcast %0 : f32 to vector<8x512xf32>
    %4 = arith.divf %2, %3 : vector<8x512xf32>
    %5 = vector.broadcast %1 : f32 to vector<8x512xf32>
    %6 = arith.mulf %4, %5 : vector<8x512xf32>
    %c0_2 = arith.constant 0 : index
    %c0_3 = arith.constant 0 : index
    %7 = vector.load %arg3[%c0_2, %c0_3] : memref<8x512xf32, #tpu.memory_space<vmem>>, vector<8x512xf32>
    tpu.vector_store %arg3[%c0_2, %c0_3], %6 {strides = array<i32>} : memref<8x512xf32, #tpu.memory_space<vmem>>, vector<8x512xf32>,
    return
  }
  func.func @transform_0(%arg0: i32) -> i32 {
    %c0_i32 = arith.constant 0 : i32
    %c0_i32_0 = arith.constant 0 : i32
    return %c0_i32 : i32
  }
  func.func @transform_1(%arg0: i32) -> (i32, i32) {
    %c0_i32 = arith.constant 0 : i32
    %c0_i32_0 = arith.constant 0 : i32
    return %arg0, %c0_i32 : i32, i32
  }
  func.func @transform_2(%arg0: i32) -> (i32, i32) {
    %c0_i32 = arith.constant 0 : i32
    %c0_i32_0 = arith.constant 0 : i32
    return %arg0, %c0_i32 : i32, i32
  }
}

</mosaic_0001>

<bundles_post_ra>
// kernel: tpu_custom_call.1
= control target key start
LH: loop header
LB: loop body
LE: loop exit
PB: predicated region body
PF: predicated region fallthrough
CT: control target
= control target key end

     0   :  { %7 = vsyncpa [#allocation5], 0  ;;  %s706_s0 = inlined_call_operand.hbm [shape: f32[2], index: 0, kind: input, shape index: {}]   ;;  %s707_s1 = inlined_call_operand.hbm [shape: f32[16,512], index: 1, kind: input, shape index: {}]   ;;  %s708_s2 = inlined_call_operand.hbm [shape: f32[16,512], index: 2, kind: output, shape index: {}]  }
   0x1   :  { %8 = vsyncpa [#allocation3], 0 }
   0x2   :  { %10 = vsyncpa [#allocation3 + $0x1], 0 }
   0x3   :  { %11 = vsyncpa [#allocation4], 0 }
   0x4   :  { %13 = vsyncpa [#allocation4 + $0x1], 0  ;;  %s501_s9 = smov 0   ;;  %s503_s10 = smov 0  }
   0x5   :  { %s505_s11 = smov 0   ;;  %s507_s12 = smov 0  }
   0x6 LB: > { %s522_s13 = sadd.s32 4294967295, %s481_s12   ;;  %s290_s14 = sadd.s32 4294967294, %s481_s12   ;;  %s481_s12 = sphi %s507_s12, %s729_s12   ;;  %s477_s11 = sphi %s505_s11, %s728_s11   ;;  %s473_s10 = sphi %s503_s10, %s727_s10   ;;  %s469_s9 = sphi %s501_s9, %s726_s9  }
   0x7   : > { %p60_p0 = scmp.ne.s32.totalorder %s473_s10, %s469_s9  ;;  %p709_p1 = scmp.eq.s32.totalorder %s522_s13, 0 }
   0x8   : > { %p90_p3 = scmp.eq.s32.totalorder %s290_s14, 1  ;;  %p291_p5 = scmp.ge.s32.totalorder %s481_s12, 1 }
   0x9   : > { %p531_p4 = por %p709_p1, %p60_p0  ;;  %p97_p7 = scmp.lt.s32.totalorder %s481_s12, 3 }
   0xa   : > { %p536_p6 = por %p90_p3, %p60_p0  ;;  %s547_s18 = sadd.s32 1, %s481_s12  }
   0xb   : > { %s712_s15 = scalar_select %p531_p4, 1, 0 }
   0xc   : > { %s713_s16 = scalar_select %p536_p6, 1, 0 }
   0xd   : > { %p541_p8 = pnand %p291_p5, %p97_p7  ;;  %s44_s19 = ssub.s32 %s481_s12, %s547_s18 }
   0xe   : > { %s47_s20 = sadd.s32 1, %s477_s11  ;;  %p560_p12 = scmp.eq.s32.totalorder %s44_s19, 0 }
   0xf   : > { %p317_p10 = pneg %p541_p8  ;;  %p54_p13 = scmp.ne.s32.totalorder %s477_s11, %s473_s10 }
  0x10   : > { %p55_p0 = scmp.eq.s32.totalorder %s481_s12, 0  ;;  %p330_p3 = scmp.lt.s32.totalorder %s481_s12, 2 }
  0x11   : > { %p556_p11 = pnand %p317_p10, %p709_p1  ;;  %s368_s25 = scalar_lea.hbm %s706_s0, 16 }
  0x12   : > { %p369_p5 = scmp.ne.s32.totalorder %s706_s0, %s368_s25  ;;  %p375_p1 = scmp.lt.u32.totalorder %s368_s25, %s706_s0 }
  0x13   : > { %p370_p7 = pneg %p556_p11 }
  0x15   : > { %p371_p10 = pnand %p370_p7, %p369_p5 }
  0x17   : > { %p372_p9 = pneg %p371_p10 }
  0x19   : > { %p377_p2 = pnand %p375_p1, %p372_p9 }
  0x1b   : > { %380 = shalt.err (!%p377_p2)
}
  0x1c   : > { %s483_s30 = smov [#allocation2]   ;;  %p56_p1 = por %p55_p0, %p54_p13 }
  0x1d   : > { %320 = dma.hbm_to_smem (!%p556_p11), %s706_s0, 16, %s483_s30, [#allocation5]  }
  0x1e   : > { %s587_s5 = scalar_select %p560_p12, %s477_s11, %s47_s20  }
  0x1f   : > { %p717_p2 = scmp.eq.s32.totalorder %s522_s13, 1  ;;  %s119_s7 = sand.u32 1, %s477_s11  }
  0x20   : > { %s307_s8 = sshll.u32 %s481_s12, 9  ;;  %s294_s14 = sshll.u32 %s119_s7, 5 }
  0x21   : > { %p599_p9 = por %p717_p2, %p54_p13  ;;  %s608_s23 = scalar_lea.hbm %s707_s1, %s307_s8 }
  0x22   : > { %s123_s20 = scalar_lea.vmem [#allocation6], %s294_s14  ;;  %p612_p11 = pnand %p330_p3, %p56_p1 }
  0x23   : > { %s718_s6 = scalar_select %p599_p9, 1, 0 }
  0x24   : > { %s131_s22 = sshll.u32 %s123_s20, 4  ;;  %s120_s25 = scalar_lea.sflag [#allocation3], %s119_s7  ;;  %s616_s22 = int_to_ptr.vmem [resolvable:$true] %s131_s22 }
  0x25   : > { %s381_s26 = scalar_lea.hbm %s608_s23, 512  ;;  %p383_p13 = pneg %p612_p11 }
  0x26   : > { %p382_p12 = scmp.ne.s32.totalorder %s608_s23, %s381_s26  ;;  %s386_s29 = scalar_lea.hbm %s707_s1, 1024 }
  0x27   : > { %p387_p3 = scmp.lt.u32.totalorder %s608_s23, %s707_s1  ;;  %p388_p7 = scmp.lt.u32.totalorder %s386_s29, %s381_s26 }
  0x28   : > { %p384_p0 = pnand %p383_p13, %p382_p12  ;;  %p390_p1 = scmp.lt.u32.totalorder %s381_s26, %s608_s23 }
  0x29   : > { %p389_p10 = por %p388_p7, %p387_p3 }
  0x2a   : > { %p385_p5 = pneg %p384_p0 }
  0x2b   : > { %p391_p2 = por %p390_p1, %p389_p10 }
  0x2d   : > { %p392_p6 = pnand %p391_p2, %p385_p5 }
  0x2f   : > { %395 = shalt.err (!%p392_p6)
}
  0x30   : > { %s396_s4 = scalar_lea.vmem %s616_s22, 512  ;;  %s484_s7 = smov [#allocation6]  }
  0x31   : > { %p397_p12 = scmp.ne.s32.totalorder %s616_s22, %s396_s4  ;;  %s401_s8 = sshll.u32 %s484_s7, 4  ;;  %s402_s8 = int_to_ptr.vmem [resolvable:$false] %s401_s8 }
  0x32   : > { %s403_s14 = scalar_lea.vmem %s402_s8, 1024  ;;  %p404_p4 = scmp.lt.s32.totalorder %s616_s22, %s402_s8 }
  0x33   : > { %p399_p0 = pnand %p397_p12, %p383_p13  ;;  %p405_p3 = scmp.lt.s32.totalorder %s403_s14, %s396_s4 }
  0x35   : > { %p400_p9 = pneg %p399_p0  ;;  %p406_p7 = por %p405_p3, %p404_p4 }
  0x37   : > { %p407_p10 = pnand %p406_p7, %p400_p9 }
  0x39   : > { %410 = shalt.err (!%p407_p10)
}
  0x3a   : > { %324 = dma.hbm_to_vmem [thread:$0]  (!%p612_p11), %s608_s23, 512, %s616_s22, %s120_s25  }
  0x3b   : > { %140 = sbr.rel (%p541_p8) target bundleno = 110 (0x6e), region = 28  ;;  %p720_p6 = scmp.eq.s32.totalorder (!%p541_p8), %s522_s13, 0 }
  0x42   : > { %456 = dma.done.wait (%p720_p6), [#allocation5], 16   ;;  %p721_p13 = pmov %p720_p6 }
  0x43   : > { %s650_s19 = sand.u32 1, %s473_s10   ;;  %p722_p4 = scmp.ne.s32.totalorder %s712_s15, 0 }
  0x44   : > { %458 = vsyncadd (%p721_p13), [#allocation5], 4294967280  ;;  %s299_s21 = sshll.u32 %s650_s19, 5  ;;  %s147_s20 = scalar_lea.sflag [#allocation3], %s650_s19 }
  0x45   : > { %s150_s24 = scalar_lea.vmem [#allocation6], %s299_s21 }
  0x46   : > { %460 = dma.done.wait (%p722_p4), %s147_s20, 512  }
  0x47   : > { %462 = vsyncadd (%p722_p4), %s147_s20, 4294966784 }
  0x48   : > { %155 = sfence }
  0x49   : > { %s172_s17 = sld [smem:[#allocation2]]  ;;  %s301_s23 = sld [smem:[#allocation2 + $0x1]]  ;;  %v174_v1 = vld [vmem:[%s150_s24] sm:$0xff]  ;;  %v175_v2 = vld [vmem:[%s150_s24 + $0x8] sm:$0xff]  ;;  %v176_v3 = vld [vmem:[%s150_s24 + $0x10] sm:$0xff] }
  0x4a   : > { %v177_v4 = vld [vmem:[%s150_s24 + $0x18] sm:$0xff]  ;;  %s308_s22 = sshll.u32 %s522_s13, 9  ;;  %s171_s25 = scalar_lea.vmem [#allocation7], %s299_s21 }
  0x4b   : > { %s208_s26 = sshll.u32 %s171_s25, 4  ;;  %s662_s28 = scalar_lea.hbm %s708_s2, %s308_s22  ;;  %s664_s26 = int_to_ptr.vmem [resolvable:$true] %s208_s26 }
  0x4c   : > { %s194_s13 = scalar_lea.sflag [#allocation4], %s650_s19  ;;  %s411_s29 = scalar_lea.vmem %s664_s26, 512 }
  0x4d   : > { %p412_p8 = scmp.ne.s32.totalorder %s664_s26, %s411_s29  ;;  %p723_p9 = scmp.ne.s32.totalorder %s718_s6, 0 }
  0x4e   : > { %s485_s30 = smov [#allocation7]  }
  0x4f   : > { %v178_v0 = vstv %s172_s17  ;;  %v184_v6 = vstv %s301_s23  ;;  %p413_p11 = pnand %p412_p8, %p723_p9  ;;  %s415_s3 = sshll.u32 %s485_s30, 4  ;;  %s416_s3 = int_to_ptr.vmem [resolvable:$false] %s415_s3 }
  0x50   : > { %366 = vrcp.f32 %v178_v0  ;;  %s417_s4 = scalar_lea.vmem %s416_s3, 1024  ;;  %p418_p1 = scmp.lt.s32.totalorder %s664_s26, %s416_s3 }
  0x51   : > { %p414_p5 = pneg %p413_p11  ;;  %p419_p2 = scmp.lt.s32.totalorder %s417_s4, %s411_s29 }
  0x53   : > { %p420_p12 = por %p419_p2, %p418_p1 }
  0x55   : > { %p421_p0 = pnand %p420_p12, %p414_p5 }
  0x5a   : > { %v367_v5 = vpop.eup %366 }
  0x5b   : > { %v180_v7 = vmul.f32 %v367_v5, %v174_v1  ;;  %v181_v8 = vmul.f32 %v367_v5, %v175_v2  ;;  %v182_v9 = vmul.f32 %v367_v5, %v176_v3  ;;  %v183_v10 = vmul.f32 %v367_v5, %v177_v4 }
  0x5d   : > { %v185_v11 = vmul.f32 %v184_v6, %v180_v7  ;;  %v186_v12 = vmul.f32 %v184_v6, %v181_v8  ;;  %v187_v13 = vmul.f32 %v184_v6, %v182_v9  ;;  %v188_v14 = vmul.f32 %v184_v6, %v183_v10 }
  0x5f   : > { %189 = vst [vmem:[%s171_s25] sm:$0xff] %v185_v11  ;;  %190 = vst [vmem:[%s171_s25 + $0x8] sm:$0xff] %v186_v12 }
  0x60   : > { %191 = vst [vmem:[%s171_s25 + $0x10] sm:$0xff] %v187_v13  ;;  %192 = vst [vmem:[%s171_s25 + $0x18] sm:$0xff] %v188_v14 }
  0x61   : > { %424 = shalt.err (!%p421_p0)
}
  0x62   : > { %s425_s7 = scalar_lea.hbm %s662_s28, 512  ;;  %s429_s19 = scalar_lea.hbm %s708_s2, 1024 }
  0x63   : > { %p426_p3 = scmp.ne.s32.totalorder %s662_s28, %s425_s7  ;;  %p430_p6 = scmp.lt.u32.totalorder %s662_s28, %s708_s2 }
  0x64   : > { %p431_p13 = scmp.lt.u32.totalorder %s429_s19, %s425_s7  ;;  %p433_p8 = scmp.lt.u32.totalorder %s425_s7, %s662_s28 }
  0x65   : > { %p427_p7 = pnand %p426_p3, %p723_p9 }
  0x66   : > { %p432_p4 = por %p431_p13, %p430_p6 }
  0x67   : > { %p428_p10 = pneg %p427_p7 }
  0x68   : > { %p434_p11 = por %p433_p8, %p432_p4 }
  0x6a   : > { %p435_p5 = pnand %p434_p11, %p428_p10 }
  0x6c   : > { %438 = shalt.err (!%p435_p5)
}
  0x6d   : > { %315 = dma.vmem_to_hbm [thread:$0]  (%p723_p9), %s664_s26, 512, %s662_s28, %s194_s13  }
  0x6e PF: > { %s220_s24 = sand.u32 1, %s469_s9   ;;  %p724_p1 = scmp.ne.s32.totalorder %s713_s16, 0 }
  0x6f   : > { %p725_p2 = scmp.ge.s32.totalorder %s481_s12, 2  ;;  %s221_s17 = scalar_lea.sflag [#allocation4], %s220_s24 }
  0x71   : > { %p326_p12 = pnand %p725_p2, %p724_p1 }
  0x73   : > { %464 = dma.done.wait (!%p326_p12), %s221_s17, 512  }
  0x74   : > { %466 = vsyncadd (!%p326_p12), %s221_s17, 4294966784  ;;  %p16_p0 = scmp.ge.s32.totalorder %s547_s18, 4   ;;  %s726_s9 = smov %s473_s10 }
  0x75   : > { %s727_s10 = smov %s477_s11  ;;  %s728_s11 = smov %s587_s5 }
  0x76   : > { %s729_s12 = smov %s547_s18  ;;  %18 = sbr.rel (!%p16_p0) target bundleno = 6 (0x6), region = 78 }
  0x7d   :  { %226 = vsyncpa [#allocation3], 1 }
  0x7e   :  { %228 = vsyncpa [#allocation3 + $0x1], 1 }
  0x7f   :  { %229 = vsyncpa [#allocation4], 1 }
  0x80   :  { %231 = vsyncpa [#allocation4 + $0x1], 1 }
  0x81   :  { %232 = vsyncpa [#allocation5], 1 }
  0x82   :  { %234 = vsyncpa [#allocation5 + $0x1], 1 }

</bundles_post_ra>
